<compile_context>
chip_gen: v5e
topology: v5e:2x2
jax: 0.10.0
libtpu: 0.0.40
codegen_flags: <defaults>
</compile_context>

<pallas_src>
import functools

import jax
import jax.numpy as jnp
from jax.experimental import pallas as pl
from jax.experimental.pallas import tpu as pltpu


def _cdiv(a, b):
    return (a + b - 1) // b


def _round_up(a, b):
    return _cdiv(a, b) * b


def _sublane_multiple(dtype) -> int:
    # Packed sublane tile: 8 for 32-bit, 16 for 16-bit, 32 for 8-bit dtypes.
    itemsize = jnp.dtype(dtype).itemsize
    return max(8, 32 // itemsize)


def _tpu_params():
    """(per-core VMEM capacity bytes, TensorCores per chip), conservative fallbacks."""
    vmem_cap = 64 << 20      # v7x per-TC value: a safe lower bound for all generations
    num_cores = 1            # safe default: skip multi-core-only tweaks
    try:
        info = pltpu.get_tpu_info()
        vmem_cap = int(getattr(info, "vmem_capacity_bytes", vmem_cap)) or vmem_cap
        for name in ("num_cores", "tensorcores_per_chip", "num_tensorcores", "core_count"):
            v = getattr(info, name, None)
            if v:
                num_cores = int(v)
                break
    except Exception:
        pass
    return vmem_cap, num_cores


def _layernorm_kernel(x_ref, g_ref, b_ref, o_ref, *, eps: float, feat: int):
    # Hot path: two lane reductions + elementwise affine.  All math in f32.
    x = x_ref[...].astype(jnp.float32)                       # (rows_blk, feat)
    mean = jnp.mean(x, axis=-1, keepdims=True)                # (rows_blk, 1)
    d = x - mean
    # torch.std default is unbiased (Bessel's correction): divide by (N - 1).
    var = jnp.sum(d * d, axis=-1, keepdims=True) * (1.0 / (feat - 1))
    std = jnp.sqrt(var)
    # One exact reciprocal per ROW (not per element); everything on the
    # (rows_blk, feat) path is VPU multiplies/adds.
    inv = pl.reciprocal(std + eps)                            # (rows_blk, 1)
    g = g_ref[...].astype(jnp.float32)                        # (1, feat)
    b = b_ref[...].astype(jnp.float32)                        # (1, feat)
    y = (d * inv) * g + b
    o_ref[...] = y.astype(o_ref.dtype)


def layer_norm_pallas(x, gamma, beta, eps=1e-6, row_block=None):
    """x: (..., features). gamma/beta: (features,). Returns same shape/dtype as x."""
    orig_shape = x.shape
    feat = orig_shape[-1]
    if feat < 2:
        raise ValueError("LayerNorm with unbiased std requires features >= 2.")

    rows = 1
    for s in orig_shape[:-1]:
        rows *= s
    x2 = x.reshape(rows, feat)
    g2 = gamma.reshape(1, feat)
    b2 = beta.reshape(1, feat)

    itemsize = jnp.dtype(x.dtype).itemsize
    sub = _sublane_multiple(x.dtype)
    vmem_cap, num_cores = _tpu_params()

    # Usable scoped-VMEM budget for this kernel (leave headroom for the compiler).
    usable = min((vmem_cap * 3) // 4, 96 << 20)

    # Per-row VMEM cost: double-buffered input + output blocks plus ~3 f32
    # temporaries (x.astype(f32), d, y) that the body materializes per block.
    bytes_per_row = feat * (2 * itemsize + 2 * itemsize + 3 * 4)
    param_bytes = feat * (jnp.dtype(gamma.dtype).itemsize + jnp.dtype(beta.dtype).itemsize)
    headroom = 2 << 20

    if row_block is None:
        target_bytes = 8 << 20    # ~8 MiB input block: mem-bound sweet spot on all gens
        rb = max(1, target_bytes // (feat * itemsize))
        rb_vmem = max(1, (usable - headroom - 4 * param_bytes) // bytes_per_row)
        rb = min(rb, rb_vmem)
        rb = max(sub, (rb // sub) * sub)
    else:
        rb = max(sub, _round_up(int(row_block), sub))

    if rows < sub:
        # Full-extent block along rows (block dim == array dim is always legal).
        rb = rows
    else:
        # Keep the block within the array; the last grid step may be partial
        # (Pallas masks its out-of-bounds writes; math is per-row so this is safe).
        rb = min(rb, (rows // sub) * sub)

    # Give both TensorCores work on multi-core chips (v7x) when the whole input
    # would otherwise be a single grid step.  Single-core chips skip this.
    if num_cores >= 2 and rows > sub and _cdiv(rows, rb) < 2:
        rb = max(sub, _round_up(_cdiv(rows, 2), sub))

    grid = (_cdiv(rows, rb),)

    # Explicit scoped-VMEM budget (v5e's default scoped limit is only 16 MiB).
    needed = rb * bytes_per_row + 4 * param_bytes + headroom
    vmem_limit = int(min(max(needed, 32 << 20), usable))

    kernel = functools.partial(_layernorm_kernel, eps=float(eps), feat=feat)

    out = pl.pallas_call(
        kernel,
        out_shape=jax.ShapeDtypeStruct((rows, feat), x.dtype),
        grid_spec=pltpu.PrefetchScalarGridSpec(
            num_scalar_prefetch=0,
            grid=grid,
            in_specs=[
                pl.BlockSpec((rb, feat), lambda i: (i, 0)),
                pl.BlockSpec((1, feat), lambda i: (0, 0)),
                pl.BlockSpec((1, feat), lambda i: (0, 0)),
            ],
            out_specs=pl.BlockSpec((rb, feat), lambda i: (i, 0)),
        ),
        compiler_params=pltpu.CompilerParams(
            dimension_semantics=("parallel",),
            vmem_limit_bytes=vmem_limit,
        ),
    )(x2, g2, b2)

    return out.reshape(orig_shape)


def _layer_norm_ref(x, gamma, beta, eps):
    # Plain-JAX reference with the same unbiased-std + eps-on-std semantics.
    feat = x.shape[-1]
    mean = jnp.mean(x, axis=-1, keepdims=True)
    std = jnp.sqrt(jnp.sum((x - mean) ** 2, axis=-1, keepdims=True) / (feat - 1))
    return gamma * (x - mean) / (std + eps) + beta


if __name__ == "__main__":
    key = jax.random.PRNGKey(0)

    # Lane-dense small case (features multiple of 128, rows a sublane multiple).
    batch, seq, features = 2, 8, 128
    x = jax.random.normal(key, (batch, seq, features), dtype=jnp.float32)
    gamma = jnp.ones((features,), dtype=jnp.float32)   # matches nn.Parameter(torch.ones)
    beta = jnp.zeros((features,), dtype=jnp.float32)   # matches nn.Parameter(torch.zeros)

    out = layer_norm_pallas(x, gamma, beta, eps=1e-6)
    jax.block_until_ready(out)
    ref = _layer_norm_ref(x, gamma, beta, 1e-6)
    assert out.shape == x.shape and out.dtype == x.dtype
    assert jnp.allclose(out, ref, atol=1e-5, rtol=1e-5), "mismatch vs reference (dense case)"

    # Partial-last-block case: odd row count (15), non-128 feature size,
    # non-trivial affine.  Exercises the masked partial-block path (no padding).
    k1, k2, k3 = jax.random.split(key, 3)
    x_odd = jax.random.normal(k1, (3, 5, 96), dtype=jnp.float32)
    g_odd = jax.random.normal(k2, (96,), dtype=jnp.float32)
    b_odd = jax.random.normal(k3, (96,), dtype=jnp.float32)
    out_odd = layer_norm_pallas(x_odd, g_odd, b_odd, eps=1e-6)
    jax.block_until_ready(out_odd)
    ref_odd = _layer_norm_ref(x_odd, g_odd, b_odd, 1e-6)
    assert out_odd.shape == x_odd.shape and out_odd.dtype == x_odd.dtype
    assert jnp.allclose(out_odd, ref_odd, atol=1e-5, rtol=1e-5), "mismatch vs reference (tail case)"

    print("KERNEL_OK")
</pallas_src>

<mosaic_0001>
module attributes {stable_mosaic.version = 11 : i64} {
  func.func @_layernorm_kernel(%arg0: i32, %arg1: memref<16x128xf32, #tpu.memory_space<vmem>>, %arg2: memref<1x128xf32, #tpu.memory_space<vmem>>, %arg3: memref<1x128xf32, #tpu.memory_space<vmem>>, %arg4: memref<16x128xf32, #tpu.memory_space<vmem>>) attributes {dimension_semantics = [#tpu.dimension_semantics<parallel>], iteration_bounds = array<i64: 1>, scalar_prefetch = 0 : i64, scratch_operands = 0 : i64, tpu.core_type = #tpu.core_type<tc>, window_params = [{transform_indices = @transform_0, window_bounds = array<i64: 16, 128>}, {pipeline_mode = #tpu.pipeline_mode<synchronous>, transform_indices = @transform_1, window_bounds = array<i64: 1, 128>}, {pipeline_mode = #tpu.pipeline_mode<synchronous>, transform_indices = @transform_2, window_bounds = array<i64: 1, 128>}, {transform_indices = @transform_3, window_bounds = array<i64: 16, 128>}]} {
    %c0 = arith.constant 0 : index
    %c0_0 = arith.constant 0 : index
    %0 = vector.load %arg1[%c0, %c0_0] : memref<16x128xf32, #tpu.memory_space<vmem>>, vector<16x128xf32>
    %cst = arith.constant dense<0.000000e+00> : vector<16xf32>
    %1 = vector.multi_reduction <add>, %0, %cst [1] : vector<16x128xf32> to vector<16xf32>
    %2 = vector.shape_cast %1 : vector<16xf32> to vector<16x1xf32>
    %cst_1 = arith.constant 1.280000e+02 : f32
    %3 = vector.broadcast %cst_1 : f32 to vector<16x1xf32>
    %4 = arith.divf %2, %3 : vector<16x1xf32>
    %5 = vector.broadcast %4 : vector<16x1xf32> to vector<16x128xf32>
    %6 = arith.subf %0, %5 : vector<16x128xf32>
    %7 = arith.mulf %6, %6 : vector<16x128xf32>
    %cst_2 = arith.constant dense<0.000000e+00> : vector<16xf32>
    %8 = vector.multi_reduction <add>, %7, %cst_2 [1] : vector<16x128xf32> to vector<16xf32>
    %9 = vector.shape_cast %8 : vector<16xf32> to vector<16x1xf32>
    %cst_3 = arith.constant 0.00787401571 : f32
    %10 = vector.broadcast %cst_3 : f32 to vector<16x1xf32>
    %11 = arith.mulf %9, %10 : vector<16x1xf32>
    %12 = math.sqrt %11 : vector<16x1xf32>
    %cst_4 = arith.constant 9.99999997E-7 : f32
    %13 = vector.broadcast %cst_4 : f32 to vector<16x1xf32>
    %14 = arith.addf %12, %13 : vector<16x1xf32>
    %15 = tpu.reciprocal %14 : vector<16x1xf32> -> vector<16x1xf32>
    %c0_5 = arith.constant 0 : index
    %c0_6 = arith.constant 0 : index
    %16 = vector.load %arg2[%c0_5, %c0_6] : memref<1x128xf32, #tpu.memory_space<vmem>>, vector<1x128xf32>
    %c0_7 = arith.constant 0 : index
    %c0_8 = arith.constant 0 : index
    %17 = vector.load %arg3[%c0_7, %c0_8] : memref<1x128xf32, #tpu.memory_space<vmem>>, vector<1x128xf32>
    %18 = vector.broadcast %15 : vector<16x1xf32> to vector<16x128xf32>
    %19 = arith.mulf %6, %18 : vector<16x128xf32>
    %20 = vector.broadcast %16 : vector<1x128xf32> to vector<16x128xf32>
    %21 = arith.mulf %19, %20 : vector<16x128xf32>
    %22 = vector.broadcast %17 : vector<1x128xf32> to vector<16x128xf32>
    %23 = arith.addf %21, %22 : vector<16x128xf32>
    %c0_9 = arith.constant 0 : index
    %c0_10 = arith.constant 0 : index
    %24 = vector.load %arg4[%c0_9, %c0_10] : memref<16x128xf32, #tpu.memory_space<vmem>>, vector<16x128xf32>
    tpu.vector_store %arg4[%c0_9, %c0_10], %23 {strides = array<i32>} : memref<16x128xf32, #tpu.memory_space<vmem>>, vector<16x128xf32>,
    return
  }
  func.func @transform_0(%arg0: i32) -> (i32, i32) {
    %c0_i32 = arith.constant 0 : i32
    %c0_i32_0 = arith.constant 0 : i32
    return %arg0, %c0_i32 : i32, i32
  }
  func.func @transform_1(%arg0: i32) -> (i32, i32) {
    %c0_i32 = arith.constant 0 : i32
    %c0_i32_0 = arith.constant 0 : i32
    %c0_i32_1 = arith.constant 0 : i32
    return %c0_i32, %c0_i32_0 : i32, i32
  }
  func.func @transform_2(%arg0: i32) -> (i32, i32) {
    %c0_i32 = arith.constant 0 : i32
    %c0_i32_0 = arith.constant 0 : i32
    %c0_i32_1 = arith.constant 0 : i32
    return %c0_i32, %c0_i32_0 : i32, i32
  }
  func.func @transform_3(%arg0: i32) -> (i32, i32) {
    %c0_i32 = arith.constant 0 : i32
    %c0_i32_0 = arith.constant 0 : i32
    return %arg0, %c0_i32 : i32, i32
  }
}

</mosaic_0001>

<bundles_post_ra>
// kernel: tpu_custom_call.1
= control target key start
LH: loop header
LB: loop body
LE: loop exit
PB: predicated region body
PF: predicated region fallthrough
CT: control target
= control target key end

     0   :  { %8 = vsyncpa [#allocation3], 0  ;;  %s305_s0 = inlined_call_operand.hbm [shape: f32[16,128], index: 0, kind: input, shape index: {}]   ;;  %s306_s1 = inlined_call_operand.hbm [shape: f32[1,128], index: 1, kind: input, shape index: {}]   ;;  %s307_s2 = inlined_call_operand.vmem [shape: f32[1,128], index: 2, kind: input, shape index: {}]   ;;  %s308_s3 = inlined_call_operand.hbm [shape: f32[16,128], index: 3, kind: output, shape index: {}]  }
   0x1   :  { %9 = vsyncpa [#allocation6], 0 }
   0x2   :  { %10 = vsyncpa [#allocation4], 0  ;;  %s15_s14 = sshll.u32 %s305_s0, 4  ;;  %s256_s15 = smov [#allocation2]   ;;  %s16_s14 = int_to_ptr.hbm [resolvable:$true] %s15_s14 }
   0x3   :  { %s17_s16 = sshll.u32 %s256_s15, 4  ;;  %s29_s19 = sshll.u32 %s306_s1, 4  ;;  %s18_s16 = int_to_ptr.vmem [resolvable:$true] %s17_s16  ;;  %s30_s19 = int_to_ptr.hbm [resolvable:$true] %s29_s19 }
   0x4   :  { %s257_s20 = smov 128   ;;  %s258_s21 = smov 8  }
   0x5   :  { %23 = dma.hbm_to_vmem [thread:$0]  %s16_s14, 256, %s18_s16, [#allocation3], %s257_s20, %s257_s20, %s258_s21  }
   0x6   :  { %s259_s22 = smov [#allocation5]  }
   0x7   :  { %s31_s23 = sshll.u32 %s259_s22, 4  ;;  %s32_s23 = int_to_ptr.vmem [resolvable:$true] %s31_s23 }
   0x8   :  { %34 = dma.hbm_to_vmem [thread:$0]  %s30_s19, 16, %s32_s23, [#allocation6]  }
   0x9   :  { %250 = dma.done.wait [#allocation3], 256  }
   0xa   :  { %251 = vsyncadd [#allocation3], 4294967040 }
   0xb   :  { %252 = dma.done.wait [#allocation6], 16  }
   0xc   :  { %253 = vsyncadd [#allocation6], 4294967280  ;;  %v45_v0 = vld [vmem:[#allocation2] sm:$0xff]  ;;  %v46_v1 = vld [vmem:[#allocation2 + $0x8] sm:$0xff]  ;;  %v260_v2 = vmov 128.0   ;;  %s261_s24 = smov [#allocation7]  }
   0xd   :  { %47 = vadd.xlane.f32.xlu0 %v45_v0  ;;  %168 = vrcp.f32 %v260_v2  ;;  %v166_v54 = vld [vmem:[#allocation5] ss:$0 sm:$0xff]  ;;  %v167_v58 = vld [vmem:[%s307_s2] ss:$0 sm:$0xff]  ;;  %s144_s25 = sshll.u32 %s261_s24, 4  ;;  %s146_s27 = sshll.u32 %s308_s3, 4  ;;  %s145_s25 = int_to_ptr.vmem [resolvable:$true] %s144_s25  ;;  %s147_s27 = int_to_ptr.hbm [resolvable:$true] %s146_s27 }
  0x13   :  { %v169_v3 = vpop.eup %168 }
  0x14   :  { %v52_v4 = vmul.f32 128.0, %v169_v3  ;;  %vm56_vm0 = vweird.f32 %v169_v3 }
  0x15   :  { %49 = vadd.xlane.f32.xlu0 %v46_v1 }
  0x16   :  { %v53_v5 = vsub.f32 1.0, %v52_v4 }
  0x18   :  { %v54_v6 = vmul.f32 %v169_v3, %v53_v5 }
  0x1a   :  { %v55_v7 = vadd.f32 %v169_v3, %v54_v6 }
  0x1c   :  { %v57_v8 = vsel %vm56_vm0, %v169_v3, %v55_v7 }
  0x80   :  { %v48_v9 = vpop.xlane.xlu0 %47 }
  0x81   :  { %v58_v10 = vmul.f32 %v57_v8, %v48_v9 }
  0x83   :  { %v60_v11 = vsub.f32 %v45_v0, %v58_v10 }
  0x85   :  { %v62_v12 = vmul.f32 %v60_v11, %v60_v11 }
  0x87   :  { %64 = vadd.xlane.f32.xlu1 %v62_v12 }
  0x88   :  { %v50_v13 = vpop.xlane.xlu0 %49 }
  0x89   :  { %v59_v14 = vmul.f32 %v57_v8, %v50_v13 }
  0x8b   :  { %v291_v15 = vsub.f32 %v46_v1, %v59_v14 }
  0x8d   :  { %v63_v16 = vmul.f32 %v291_v15, %v291_v15 }
  0x8f   :  { %66 = vadd.xlane.f32.xlu1 %v63_v16 }
  0xfa   :  { %v65_v17 = vpop.xlane.xlu1 %64 }
  0xfb   :  { %v68_v18 = vmul.f32 0.007874016, %v65_v17 }
  0xfd   :  { %170 = vrsqrt.f32 %v68_v18  ;;  %vm77_vm1 = vcmp.eq.f32.partialorder %v68_v18, inf  ;;  %v80_v31 = vand.u32 2147483648, %v68_v18  ;;  %vm79_vm2 = vcmp.eq.f32.partialorder %v68_v18, 0.0 }
 0x102   :  { %v67_v19 = vpop.xlane.xlu1 %66 }
 0x103   :  { %v171_v20 = vpop.eup %170  ;;  %v69_v21 = vmul.f32 0.007874016, %v67_v19 }
 0x104   :  { %v71_v22 = vmul.f32 %v171_v20, %v68_v18 }
 0x105   :  { %172 = vrsqrt.f32 %v69_v21  ;;  %vm89_vm3 = vcmp.eq.f32.partialorder %v69_v21, inf  ;;  %v92_v39 = vand.u32 2147483648, %v69_v21  ;;  %vm91_vm4 = vcmp.eq.f32.partialorder %v69_v21, 0.0 }
 0x106   :  { %v72_v23 = vmul.f32 %v171_v20, %v71_v22 }
 0x108   :  { %v73_v24 = vmul.f32 0.5, %v72_v23 }
 0x10a   :  { %v74_v25 = vsub.f32 1.5, %v73_v24 }
 0x10b   :  { %v173_v26 = vpop.eup %172 }
 0x10c   :  { %v75_v27 = vmul.f32 %v171_v20, %v74_v25  ;;  %v83_v28 = vmul.f32 %v173_v26, %v69_v21 }
 0x10e   :  { %v76_v29 = vmul.f32 %v75_v27, %v68_v18  ;;  %v84_v30 = vmul.f32 %v173_v26, %v83_v28 }
 0x110   :  { %v78_v32 = vsel %vm77_vm1, %v68_v18, %v76_v29  ;;  %v85_v33 = vmul.f32 0.5, %v84_v30 }
 0x111   :  { %v81_v34 = vsel %vm79_vm2, %v80_v31, %v78_v32 }
 0x112   :  { %v94_v35 = vadd.f32 1e-06, %v81_v34  ;;  %v86_v36 = vsub.f32 1.5, %v85_v33 }
 0x114   :  { %174 = vrcp.f32 %v94_v35  ;;  %v87_v37 = vmul.f32 %v173_v26, %v86_v36  ;;  %v107_v46 = vand.u32 2147483648, %v94_v35  ;;  %v105_v48 = vand.u32 2147483647, %v94_v35 }
 0x115   :  { %vm101_vm6 = vweird.f32 %v94_v35 }
 0x116   :  { %v88_v38 = vmul.f32 %v87_v37, %v69_v21  ;;  %v108_v51 = vor.u32 1.1754944e-38, %v107_v46  ;;  %vm106_vm8 = vcmp.eq.f32.partialorder %v105_v48, 8.507059e+37 }
 0x118   :  { %v90_v40 = vsel %vm89_vm3, %v69_v21, %v88_v38 }
 0x119   :  { %v93_v41 = vsel %vm91_vm4, %v92_v39, %v90_v40 }
 0x11a   :  { %v175_v42 = vpop.eup %174  ;;  %v95_v43 = vadd.f32 1e-06, %v93_v41 }
 0x11b   :  { %v97_v44 = vmul.f32 %v175_v42, %v94_v35  ;;  %vm102_vm5 = vweird.f32 %v175_v42 }
 0x11c   :  { %176 = vrcp.f32 %v95_v43  ;;  %vm103_vm7 = vmor %vm101_vm6, %vm102_vm5  ;;  %v121_v59 = vand.u32 2147483648, %v95_v43  ;;  %v119_v61 = vand.u32 2147483647, %v95_v43  ;;  %vm115_vm10 = vweird.f32 %v95_v43 }
 0x11d   :  { %v98_v45 = vsub.f32 1.0, %v97_v44 }
 0x11e   :  { %v122_v1 = vor.u32 1.1754944e-38, %v121_v59  ;;  %vm120_vm12 = vcmp.eq.f32.partialorder %v119_v61, 8.507059e+37 }
 0x11f   :  { %v99_v47 = vmul.f32 %v175_v42, %v98_v45 }
 0x121   :  { %v100_v49 = vadd.f32 %v175_v42, %v99_v47 }
 0x122   :  { %v177_v50 = vpop.eup %176 }
 0x123   :  { %v104_v52 = vsel %vm103_vm7, %v175_v42, %v100_v49  ;;  %v111_v53 = vmul.f32 %v177_v50, %v95_v43  ;;  %vm116_vm9 = vweird.f32 %v177_v50 }
 0x124   :  { %v109_v55 = vsel %vm106_vm8, %v108_v51, %v104_v52  ;;  %vm117_vm11 = vmor %vm115_vm10, %vm116_vm9 }
 0x125   :  { %v112_v56 = vsub.f32 1.0, %v111_v53  ;;  %v126_v57 = vmul.f32 %v109_v55, %v60_v11 }
 0x127   :  { %v113_v60 = vmul.f32 %v177_v50, %v112_v56  ;;  %v131_v62 = vmul.f32 %v166_v54, %v126_v57 }
 0x129   :  { %v114_v63 = vadd.f32 %v177_v50, %v113_v60  ;;  %v136_v0 = vadd.f32 %v167_v58, %v131_v62 }
 0x12b   :  { %v118_v2 = vsel %vm117_vm11, %v177_v50, %v114_v63  ;;  %138 = vst [vmem:[#allocation7] sm:$0xff] %v136_v0 }
 0x12c   :  { %v123_v3 = vsel %vm120_vm12, %v122_v1, %v118_v2 }
 0x12d   :  { %v127_v4 = vmul.f32 %v123_v3, %v291_v15 }
 0x12f   :  { %v132_v5 = vmul.f32 %v166_v54, %v127_v4 }
 0x131   :  { %v137_v6 = vadd.f32 %v167_v58, %v132_v5 }
 0x133   :  { %139 = vst [vmem:[#allocation7 + $0x8] sm:$0xff] %v137_v6 }
 0x134   :  { %152 = dma.vmem_to_hbm [thread:$0]  %s145_s25, 256, %s147_s27, [#allocation4], %s257_s20, %s257_s20, %s258_s21  }
 0x135   :  { %254 = dma.done.wait [#allocation4], 256  }
 0x136   :  { %255 = vsyncadd [#allocation4], 4294967040 }
 0x137   :  { %157 = vsyncpa [#allocation3], 1 }
 0x138   :  { %158 = vsyncpa [#allocation6], 1 }
 0x139   :  { %159 = vsyncpa [#allocation4], 1 }

</bundles_post_ra>
